<compile_context>
chip_gen: v5e
topology: v5e:2x2
jax: 0.10.0
libtpu: 0.0.40
codegen_flags: <defaults>
</compile_context>

<pallas_src>
import math
import functools

import jax
import jax.numpy as jnp
from jax import lax
from jax.experimental import pallas as pl
from jax.experimental.pallas import tpu as pltpu


_NEG_INF = -1e30  # large finite negative: safe for online softmax / masking


def _pick_tile(T, dtype):
    """Largest tile <= target that divides T and matches sublane packing."""
    try:
        kind = jax.devices()[0].device_kind.lower()
    except Exception:
        kind = ""
    # v5e: 128-wide MXU + tightest roofline -> smaller token tile.
    target = 128 if ("v5e" in kind or "v5 lite" in kind or "v5lite" in kind) else 256
    itemsize = jnp.dtype(dtype).itemsize
    sub = 8 if itemsize >= 4 else (16 if itemsize == 2 else 32)
    if T <= target:
        return T
    for t in range(target, sub - 1, -sub):
        if T % t == 0:
            return t
    return T


def _qkv_proj_kernel(x_ref, w_ref, q_ref, k_ref, v_ref, *, d_model):
    # x block: (1, tile, D); w: fused (D, 3D) pre-transposed weight
    # (Wq columns already pre-scaled by 1/sqrt(head_dim) in the wrapper).
    x = x_ref[0]
    y = jnp.dot(x, w_ref[...], preferred_element_type=jnp.float32)   # (tile, 3D)
    q_ref[0] = y[:, :d_model].astype(q_ref.dtype)
    k_ref[0] = y[:, d_model:2 * d_model].astype(k_ref.dtype)
    v_ref[0] = y[:, 2 * d_model:].astype(v_ref.dtype)


def _flash_attn_kernel(q_ref, k_ref, v_ref, wo_ref, bo_ref, o_ref,
                       m_ref, l_ref, acc_ref,
                       *, num_heads, head_dim, tq, tk):
    qi = pl.program_id(1)
    ki = pl.program_id(2)
    num_kv = pl.num_programs(2)

    @pl.when(ki == 0)
    def _init():
        m_ref[...] = jnp.full_like(m_ref, _NEG_INF)
        l_ref[...] = jnp.zeros_like(l_ref)
        acc_ref[...] = jnp.zeros_like(acc_ref)

    def _update(apply_mask):
        q = q_ref[0]                    # (H, tq, hd)  -- head-major, pre-scaled
        k = k_ref[0]                    # (H, tk, hd)
        v = v_ref[0]                    # (H, tk, hd)

        # Batched over heads on the MXU: no per-head lane slicing.
        s = jnp.einsum('hqd,hkd->hqk', q, k,
                       preferred_element_type=jnp.float32)           # (H, tq, tk)
        if apply_mask:
            # Only the diagonal tile crosses the causal boundary.
            q_pos = qi * tq + lax.broadcasted_iota(jnp.int32, (tq, tk), 0)
            k_pos = ki * tk + lax.broadcasted_iota(jnp.int32, (tq, tk), 1)
            s = jnp.where((k_pos > q_pos)[None], _NEG_INF, s)

        m_prev = m_ref[...]                                           # (H, tq, 1)
        m_new = jnp.maximum(m_prev, jnp.max(s, axis=-1, keepdims=True))
        alpha = jnp.exp(m_prev - m_new)
        p = jnp.exp(s - m_new)
        l_ref[...] = alpha * l_ref[...] + jnp.sum(p, axis=-1, keepdims=True)
        acc_ref[...] = alpha * acc_ref[...] + jnp.einsum(
            'hqk,hkd->hqd', p.astype(v.dtype), v,
            preferred_element_type=jnp.float32)
        m_ref[...] = m_new

    # Fully-visible tiles: no mask construction, no per-element select.
    @pl.when(ki < qi)
    def _full_tile():
        _update(apply_mask=False)

    # Diagonal tile: causal boundary crosses it.
    @pl.when(ki == qi)
    def _diag_tile():
        _update(apply_mask=True)

    # ki > qi: causally dead -> no compute, and the clamped K/V index_maps
    # mean no DMA was issued for these steps either.

    @pl.when(ki == num_kv - 1)
    def _finalize():
        d_model = num_heads * head_dim
        # EUP approx reciprocal: softmax denominator off the VALU path.
        inv_l = pl.reciprocal(l_ref[...], approx=True)                # (H, tq, 1)
        ctx = acc_ref[...] * inv_l                                    # (H, tq, hd) f32
        out = jnp.zeros((tq, d_model), jnp.float32)
        wo_dtype = wo_ref.dtype
        for h in range(num_heads):                                    # leading-axis only
            out = out + jnp.dot(ctx[h].astype(wo_dtype), wo_ref[h],
                                preferred_element_type=jnp.float32)
        out = out + bo_ref[...].astype(jnp.float32)                   # (1, D) broadcast
        o_ref[0] = out.astype(o_ref.dtype)


def mhsa_forward(x, wq, wk, wv, wo, bo, *, num_heads):
    B, T, D = x.shape
    assert D % num_heads == 0
    head_dim = D // num_heads
    scale = 1.0 / math.sqrt(head_dim)

    # Wrapper-side weight prep (PyTorch W is (out, in)): fuse Q/K/V into one
    # (D, 3D) matrix with Wq pre-scaled, and view Wo^T head-major (H, hd, D).
    w_qkv = jnp.concatenate([wq.T * scale, wk.T, wv.T], axis=1)       # (D, 3D)
    wo_heads = wo.T.reshape(num_heads, head_dim, D)                   # (H, hd, D)
    bo2 = bo.reshape(1, D)

    tile = _pick_tile(T, x.dtype)
    n_t = T // tile

    # ---- kernel 1: fused Q/K/V projection (one wide MXU pass) ----
    q, k, v = pl.pallas_call(
        functools.partial(_qkv_proj_kernel, d_model=D),
        out_shape=(jax.ShapeDtypeStruct((B, T, D), x.dtype),) * 3,
        grid_spec=pltpu.PrefetchScalarGridSpec(
            num_scalar_prefetch=0,
            grid=(B, n_t),
            in_specs=[
                pl.BlockSpec((1, tile, D), lambda b, t: (b, t, 0)),   # x
                pl.BlockSpec((D, 3 * D), lambda b, t: (0, 0)),        # fused W^T
            ],
            out_specs=[
                pl.BlockSpec((1, tile, D), lambda b, t: (b, t, 0)),
                pl.BlockSpec((1, tile, D), lambda b, t: (b, t, 0)),
                pl.BlockSpec((1, tile, D), lambda b, t: (b, t, 0)),
            ],
        ),
        compiler_params=pltpu.CompilerParams(
            dimension_semantics=("parallel", "parallel")),
    )(x, w_qkv)

    # Layout plumbing (XLA, once): head-major (B, H, T, hd) so the flash
    # kernel never slices the lane (d_model) axis per head.
    q = q.reshape(B, T, num_heads, head_dim).transpose(0, 2, 1, 3)
    k = k.reshape(B, T, num_heads, head_dim).transpose(0, 2, 1, 3)
    v = v.reshape(B, T, num_heads, head_dim).transpose(0, 2, 1, 3)

    # ---- kernel 2: flash attention (online softmax) + output projection ----
    tq = tk = tile
    n_q = T // tq
    n_k = T // tk
    kernel = functools.partial(_flash_attn_kernel, num_heads=num_heads,
                               head_dim=head_dim, tq=tq, tk=tk)

    # Clamp the kv block index for causally-dead tiles (ki > qi, tq == tk):
    # the pipeline then repeats the previous block index and skips the fetch.
    kv_index_map = lambda b, qi, ki: (b, 0, jnp.minimum(ki, qi), 0)

    out = pl.pallas_call(
        kernel,
        out_shape=jax.ShapeDtypeStruct((B, T, D), x.dtype),
        grid_spec=pltpu.PrefetchScalarGridSpec(
            num_scalar_prefetch=0,
            grid=(B, n_q, n_k),
            in_specs=[
                pl.BlockSpec((1, num_heads, tq, head_dim),
                             lambda b, qi, ki: (b, 0, qi, 0)),        # Q
                pl.BlockSpec((1, num_heads, tk, head_dim), kv_index_map),  # K
                pl.BlockSpec((1, num_heads, tk, head_dim), kv_index_map),  # V
                pl.BlockSpec((num_heads, head_dim, D),
                             lambda b, qi, ki: (0, 0, 0)),            # Wo^T (head-major)
                pl.BlockSpec((1, D), lambda b, qi, ki: (0, 0)),       # bo
            ],
            out_specs=pl.BlockSpec((1, tq, D), lambda b, qi, ki: (b, qi, 0)),
            scratch_shapes=[
                pltpu.VMEM((num_heads, tq, 1), jnp.float32),          # running max
                pltpu.VMEM((num_heads, tq, 1), jnp.float32),          # running sum
                pltpu.VMEM((num_heads, tq, head_dim), jnp.float32),   # ctx acc
            ],
        ),
        compiler_params=pltpu.CompilerParams(
            dimension_semantics=("parallel", "parallel", "arbitrary")),
    )(q, k, v, wo_heads, bo2)
    return out


def mhsa_reference(x, wq, wk, wv, wo, bo, *, num_heads):
    """Pure-JAX reference mirroring the PyTorch forward (eval mode)."""
    B, T, D = x.shape
    hd = D // num_heads
    q = x @ wq.T
    k = x @ wk.T
    v = x @ wv.T
    q = q.reshape(B, T, num_heads, hd).transpose(0, 2, 1, 3)
    k = k.reshape(B, T, num_heads, hd).transpose(0, 2, 1, 3)
    v = v.reshape(B, T, num_heads, hd).transpose(0, 2, 1, 3)
    scores = jnp.einsum('bhqd,bhkd->bhqk', q, k)
    mask = jnp.triu(jnp.ones((T, T), bool), k=1)
    scores = jnp.where(mask, -jnp.inf, scores)
    w = jax.nn.softmax(scores / math.sqrt(hd), axis=-1)
    ctx = jnp.einsum('bhqk,bhkd->bhqd', w, v)
    ctx = ctx.transpose(0, 2, 1, 3).reshape(B, T, D)
    return ctx @ wo.T + bo


if __name__ == "__main__":
    # Module config consistent with forward: x is (B, T, d_model)
    B, T, d_model, num_heads = 2, 8, 32, 4

    key = jax.random.PRNGKey(0)
    kx, kq, kk, kv, ko, kb = jax.random.split(key, 6)

    x = jax.random.normal(kx, (B, T, d_model), dtype=jnp.float32)

    # Deterministic parameter init (PyTorch Linear convention: W is (out, in))
    bound = 1.0 / math.sqrt(d_model)
    wq = jax.random.uniform(kq, (d_model, d_model), jnp.float32, -bound, bound)
    wk = jax.random.uniform(kk, (d_model, d_model), jnp.float32, -bound, bound)
    wv = jax.random.uniform(kv, (d_model, d_model), jnp.float32, -bound, bound)
    wo = jax.random.uniform(ko, (d_model, d_model), jnp.float32, -bound, bound)
    bo = jax.random.uniform(kb, (d_model,), jnp.float32, -bound, bound)

    out = mhsa_forward(x, wq, wk, wv, wo, bo, num_heads=num_heads)
    out = jax.block_until_ready(out)

    ref = mhsa_reference(x, wq, wk, wv, wo, bo, num_heads=num_heads)
    assert out.shape == (B, T, d_model)
    # Tolerance accounts for the EUP approximate reciprocal on the softmax
    # denominator (pl.reciprocal(..., approx=True)).
    assert jnp.allclose(out, ref, atol=2e-3, rtol=2e-3), "mismatch vs reference"

    print("KERNEL_OK")
</pallas_src>

<mosaic_0001>
module attributes {stable_mosaic.version = 11 : i64} {
  func.func @_qkv_proj_kernel(%arg0: i32, %arg1: i32, %arg2: memref<1x8x32xf32, #tpu.memory_space<vmem>>, %arg3: memref<32x96xf32, #tpu.memory_space<vmem>>, %arg4: memref<1x8x32xf32, #tpu.memory_space<vmem>>, %arg5: memref<1x8x32xf32, #tpu.memory_space<vmem>>, %arg6: memref<1x8x32xf32, #tpu.memory_space<vmem>>) attributes {dimension_semantics = [#tpu.dimension_semantics<parallel>, #tpu.dimension_semantics<parallel>], iteration_bounds = array<i64: 2, 1>, scalar_prefetch = 0 : i64, scratch_operands = 0 : i64, tpu.core_type = #tpu.core_type<tc>, window_params = [{transform_indices = @transform_0, window_bounds = array<i64: 1, 8, 32>}, {pipeline_mode = #tpu.pipeline_mode<synchronous>, transform_indices = @transform_1, window_bounds = array<i64: 32, 96>}, {transform_indices = @transform_2, window_bounds = array<i64: 1, 8, 32>}, {transform_indices = @transform_3, window_bounds = array<i64: 1, 8, 32>}, {transform_indices = @transform_4, window_bounds = array<i64: 1, 8, 32>}]} {
    %c0 = arith.constant 0 : index
    %c0_0 = arith.constant 0 : index
    %c0_1 = arith.constant 0 : index
    %0 = vector.load %arg2[%c0, %c0_0, %c0_1] : memref<1x8x32xf32, #tpu.memory_space<vmem>>, vector<1x8x32xf32>
    %1 = vector.shape_cast %0 : vector<1x8x32xf32> to vector<8x32xf32>
    %c0_2 = arith.constant 0 : index
    %c0_3 = arith.constant 0 : index
    %2 = vector.load %arg3[%c0_2, %c0_3] : memref<32x96xf32, #tpu.memory_space<vmem>>, vector<32x96xf32>
    %cst = arith.constant dense<0.000000e+00> : vector<8x96xf32>
    %3 = tpu.matmul %1, %2, %cst {dimension_numbers = #tpu.dot_dimension_numbers<[1], [0], [0], [1], [0, 0, 1, 1], [], []>} : vector<8x32xf32>, vector<32x96xf32>, vector<8x96xf32> -> vector<8x96xf32>
    %4 = vector.extract_strided_slice %3 {offsets = [0, 0], sizes = [8, 32], strides = [1, 1]} : vector<8x96xf32> to vector<8x32xf32>
    %c0_4 = arith.constant 0 : index
    %c0_5 = arith.constant 0 : index
    %c0_6 = arith.constant 0 : index
    %5 = vector.load %arg4[%c0_4, %c0_5, %c0_6] : memref<1x8x32xf32, #tpu.memory_space<vmem>>, vector<1x8x32xf32>
    %6 = vector.shape_cast %5 : vector<1x8x32xf32> to vector<8x32xf32>
    %7 = vector.shape_cast %4 : vector<8x32xf32> to vector<1x8x32xf32>
    tpu.vector_store %arg4[%c0_4, %c0_5, %c0_6], %7 {strides = array<i32>} : memref<1x8x32xf32, #tpu.memory_space<vmem>>, vector<1x8x32xf32>,
    %8 = vector.extract_strided_slice %3 {offsets = [0, 32], sizes = [8, 32], strides = [1, 1]} : vector<8x96xf32> to vector<8x32xf32>
    %c0_7 = arith.constant 0 : index
    %c0_8 = arith.constant 0 : index
    %c0_9 = arith.constant 0 : index
    %9 = vector.load %arg5[%c0_7, %c0_8, %c0_9] : memref<1x8x32xf32, #tpu.memory_space<vmem>>, vector<1x8x32xf32>
    %10 = vector.shape_cast %9 : vector<1x8x32xf32> to vector<8x32xf32>
    %11 = vector.shape_cast %8 : vector<8x32xf32> to vector<1x8x32xf32>
    tpu.vector_store %arg5[%c0_7, %c0_8, %c0_9], %11 {strides = array<i32>} : memref<1x8x32xf32, #tpu.memory_space<vmem>>, vector<1x8x32xf32>,
    %12 = vector.extract_strided_slice %3 {offsets = [0, 64], sizes = [8, 32], strides = [1, 1]} : vector<8x96xf32> to vector<8x32xf32>
    %c0_10 = arith.constant 0 : index
    %c0_11 = arith.constant 0 : index
    %c0_12 = arith.constant 0 : index
    %13 = vector.load %arg6[%c0_10, %c0_11, %c0_12] : memref<1x8x32xf32, #tpu.memory_space<vmem>>, vector<1x8x32xf32>
    %14 = vector.shape_cast %13 : vector<1x8x32xf32> to vector<8x32xf32>
    %15 = vector.shape_cast %12 : vector<8x32xf32> to vector<1x8x32xf32>
    tpu.vector_store %arg6[%c0_10, %c0_11, %c0_12], %15 {strides = array<i32>} : memref<1x8x32xf32, #tpu.memory_space<vmem>>, vector<1x8x32xf32>,
    return
  }
  func.func @transform_0(%arg0: i32, %arg1: i32) -> (i32, i32, i32) {
    %c0_i32 = arith.constant 0 : i32
    %c0_i32_0 = arith.constant 0 : i32
    return %arg0, %arg1, %c0_i32 : i32, i32, i32
  }
  func.func @transform_1(%arg0: i32, %arg1: i32) -> (i32, i32) {
    %c0_i32 = arith.constant 0 : i32
    %c0_i32_0 = arith.constant 0 : i32
    %c0_i32_1 = arith.constant 0 : i32
    return %c0_i32, %c0_i32_0 : i32, i32
  }
  func.func @transform_2(%arg0: i32, %arg1: i32) -> (i32, i32, i32) {
    %c0_i32 = arith.constant 0 : i32
    %c0_i32_0 = arith.constant 0 : i32
    return %arg0, %arg1, %c0_i32 : i32, i32, i32
  }
  func.func @transform_3(%arg0: i32, %arg1: i32) -> (i32, i32, i32) {
    %c0_i32 = arith.constant 0 : i32
    %c0_i32_0 = arith.constant 0 : i32
    return %arg0, %arg1, %c0_i32 : i32, i32, i32
  }
  func.func @transform_4(%arg0: i32, %arg1: i32) -> (i32, i32, i32) {
    %c0_i32 = arith.constant 0 : i32
    %c0_i32_0 = arith.constant 0 : i32
    return %arg0, %arg1, %c0_i32 : i32, i32, i32
  }
}

</mosaic_0001>

<bundles_post_ra>
// kernel: tpu_custom_call.1
= control target key start
LH: loop header
LB: loop body
LE: loop exit
PB: predicated region body
PF: predicated region fallthrough
CT: control target
= control target key end

     0   :  { %10 = vsyncpa [#allocation3], 0  ;;  %s1062_s0 = inlined_call_operand.hbm [shape: f32[2,8,32], index: 0, kind: input, shape index: {}]   ;;  %s1063_s1 = inlined_call_operand.hbm [shape: f32[32,96], index: 1, kind: input, shape index: {}]   ;;  %s1064_s2 = inlined_call_operand.hbm [shape: f32[2,8,32], index: 2, kind: output, shape index: {0}]   ;;  %s1065_s3 = inlined_call_operand.hbm [shape: f32[2,8,32], index: 3, kind: output, shape index: {1}]   ;;  %s1066_s4 = inlined_call_operand.hbm [shape: f32[2,8,32], index: 4, kind: output, shape index: {2}]  }
   0x1   :  { %12 = vsyncpa [#allocation3 + $0x1], 0 }
   0x2   :  { %13 = vsyncpa [#allocation6], 0 }
   0x3   :  { %14 = vsyncpa [#allocation4], 0 }
   0x4   :  { %16 = vsyncpa [#allocation4 + $0x1], 0 }
   0x5   :  { %17 = vsyncpa [#allocation9], 0 }
   0x6   :  { %19 = vsyncpa [#allocation9 + $0x1], 0  ;;  %s869_s15 = smov 0   ;;  %s871_s16 = smov 0  }
   0x7   :  { %s873_s17 = smov 0   ;;  %s875_s18 = smov 0  }
   0x8   :  { %s877_s19 = smov 0   ;;  %s879_s20 = smov 0  }
   0x9 LB: > { %s900_s21 = sadd.s32 4294967295, %s837_s20   ;;  %p524_p0 = scmp.ge.s32.totalorder %s837_s20, 1  ;;  %s837_s20 = sphi %s879_s20, %s25_s20   ;;  %s833_s19 = sphi %s877_s19, %s1078_s19   ;;  %s829_s18 = sphi %s875_s18, %s1077_s18   ;;  %s825_s17 = sphi %s873_s17, %s1076_s17   ;;  %s821_s16 = sphi %s871_s16, %s1075_s16   ;;  %s817_s15 = sphi %s869_s15, %s1074_s15  }
   0xa   : > { %p60_p1 = scmp.eq.s32.totalorder %s900_s21, 0  ;;  %p175_p2 = scmp.lt.s32.totalorder %s837_s20, 3 }
   0xb   : > { %s186_s24 = sshll.u32 %s1063_s1, 4  ;;  %s839_s26 = smov [#allocation5]   ;;  %s187_s24 = int_to_ptr.hbm [resolvable:$true] %s186_s24 }
   0xc   : > { %p908_p3 = pnand %p524_p0, %p175_p2  ;;  %s188_s27 = sshll.u32 %s839_s26, 4  ;;  %s189_s27 = int_to_ptr.vmem [resolvable:$true] %s188_s27 }
   0xd   : > { %p526_p6 = scmp.ge.s32.totalorder %s837_s20, 2  ;;  %s840_s28 = smov 128  }
   0xe   : > { %p556_p4 = pneg %p908_p3  ;;  %s841_s29 = smov 8  }
   0xf   : > { %s1067_s30 = sadd.s32 4294967294, %s837_s20   ;;  %s37_s5 = sadd.s32 1, %s833_s19 }
  0x10   : > { %p557_p5 = pnand %p556_p4, %p60_p1  ;;  %s46_s6 = sadd.s32 1, %s825_s17 }
  0x11   : > { %p39_p7 = scmp.ge.s32.totalorder %s37_s5, 2  ;;  %p53_p8 = scmp.ne.s32.totalorder %s825_s17, %s821_s16 }
  0x12   : > { %559 = dma.hbm_to_vmem [thread:$0]  (!%p557_p5), %s187_s24, 512, %s189_s27, [#allocation6], %s840_s28, %s840_s28, %s841_s29  }
  0x13   : > { %p54_p9 = scmp.eq.s32.totalorder %s837_s20, 0  ;;  %p59_p10 = scmp.ne.s32.totalorder %s821_s16, %s817_s15 }
  0x14   : > { %s1080_s5 = smov (%p39_p7, %s37_s5), 0  ;;  %p106_p13 = scmp.eq.s32.totalorder %s900_s21, 1 }
  0x15   : > { %p927_p11 = por %p54_p9, %p53_p8  ;;  %p933_p12 = por %p60_p1, %p59_p10 }
  0x16   : > { %s41_s9 = ssub.s32 %s833_s19, %s1080_s5  ;;  %p112_p2 = scmp.eq.s32.totalorder %s1067_s30, 1 }
  0x17   : > { %p44_p0 = scmp.eq.s32.totalorder %s41_s9, 0  ;;  %p942_p4 = por %p106_p13, %p53_p8 }
  0x18   : > { %p575_p5 = scmp.lt.s32.totalorder %s837_s20, 2  ;;  %p950_p7 = por %p112_p2, %p59_p10 }
  0x19   : > { %s948_s11 = scalar_select %p44_p0, %s825_s17, %s46_s6  }
  0x1a   : > { %s202_s13 = sand.u32 1, %s825_s17   ;;  %s528_s22 = sshll.u32 %s833_s19, 3 }
  0x1b   : > { %s527_s14 = sshll.u32 %s202_s13, 3  ;;  %s211_s26 = scalar_lea.hbm %s1062_s0, %s528_s22 }
  0x1c   : > { %s206_s27 = scalar_lea.vmem [#allocation2], %s527_s14  ;;  %s213_s29 = sshll.u32 %s211_s26, 4  ;;  %s214_s29 = int_to_ptr.hbm [resolvable:$true] %s213_s29 }
  0x1d   : > { %s215_s28 = sshll.u32 %s206_s27, 4  ;;  %p561_p8 = pnand %p575_p5, %p927_p11  ;;  %s216_s28 = int_to_ptr.vmem [resolvable:$true] %s215_s28 }
  0x1e   : > { %s203_s6 = scalar_lea.sflag [#allocation3], %s202_s13  ;;  %224 = sbr.rel (%p908_p3) target bundleno = 303 (0x12f), region = 28 }
  0x1f   : > { %563 = dma.hbm_to_vmem [thread:$0]  (!%p561_p8), %s214_s29, 128, %s216_s28, %s203_s6  }
  0x20   : > { %s964_s9 = sand.u32 (!%p908_p3), 1, %s821_s16  }
  0x21   : > { %s967_s23 = sshll.u32 (!%p908_p3), %s964_s9, 3  ;;  %s227_s14 = scalar_lea.sflag (!%p908_p3), [#allocation3], %s964_s9 }
  0x22   : > { %s230_s22 = scalar_lea.vmem (!%p908_p3), [#allocation2], %s967_s23 }
  0x23   : > { %800 = dma.done.wait (%p933_p12), %s227_s14, 128  }
  0x24   : > { %802 = vsyncadd (%p933_p12), %s227_s14, 4294967168 }
  0x25   : > { %804 = dma.done.wait (%p60_p1), [#allocation6], 512  }
  0x26   : > { %806 = vsyncadd (%p60_p1), [#allocation6], 4294966784  ;;  %v275_v0 = vld [vmem:[#allocation5 + $0x18] sm:$0xff]  ;;  %v274_v1 = vld [vmem:[#allocation5 + $0x10] sm:$0xff]  ;;  %vm276_vm0 = vcmask 261120   ;;  %s981_s25 = sshll.u32 %s829_s18, 3 }
  0x27   : > { %292 = vmatpush.msra.mxu0 %v275_v0  ;;  %v273_v2 = vld [vmem:[#allocation5 + $0x8] sm:$0xff]  ;;  %v272_v3 = vld [vmem:[#allocation5] sm:$0xff]  ;;  %v271_v4 = vld [vmem:[%s230_s22] sm:$0xff]  ;;  %s332_s13 = scalar_lea.hbm %s1064_s2, %s981_s25  ;;  %s256_s24 = scalar_lea.vmem [#allocation7], %s967_s23 }
  0x28   : > { %s334_s26 = sshll.u32 %s256_s24, 4  ;;  %s336_s27 = sshll.u32 %s332_s13, 4  ;;  %s335_s26 = int_to_ptr.vmem [resolvable:$true] %s334_s26  ;;  %s337_s27 = int_to_ptr.hbm [resolvable:$true] %s336_s27 }
  0x29   : > { %293 = vmatpush.msra.mxu0 %v274_v1  ;;  %s842_s28 = smov 96   ;;  %s311_s29 = scalar_lea.sflag [#allocation4], %s964_s9 }
  0x2a   : > { %s705_s6 = sshra.s32 %s337_s27, 4  ;;  %s711_s7 = scalar_lea.hbm %s1064_s2, 16  ;;  %s706_s6 = int_to_ptr.hbm [resolvable:$true] %s705_s6 }
  0x2b   : > { %294 = vmatpush.msra.mxu0 %v273_v2  ;;  %s707_s18 = scalar_lea.hbm %s706_s6, 8  ;;  %p712_p10 = scmp.lt.s32.totalorder %s706_s6, %s1064_s2 }
  0x2c   : > { %p708_p1 = scmp.ne.s32.totalorder %s706_s6, %s707_s18  ;;  %p713_p11 = scmp.lt.s32.totalorder %s711_s7, %s707_s18 }
  0x2d   : > { %295 = vmatpush.msra.mxu0 %v272_v3 }
  0x2e   : > { %535 = vmatmul.msk.f32.vlgmr.msra.gmra.mxu0 %vm276_vm0, %v271_v4  ;;  %p709_p3 = pnand %p708_p1, %p942_p4  ;;  %p714_p12 = por %p713_p11, %p712_p10 }
  0x30   : > { %p710_p9 = pneg %p709_p3 }
  0x32   : > { %p715_p13 = pnand %p714_p12, %p710_p9 }
  0xab   : > { %v297_v5 = vpop.f32.mrf.mxu0 }
  0xac   : > { %300 = vst.msk [vmem:[%s256_s24] sm:$0xff] %vm276_vm0, %v297_v5  ;;  %302 = vrot.lane.b32.xlu0 %v297_v5, %s842_s28 }
  0xad   : > { %718 = shalt.err (!%p715_p13)
}
  0xae   : > { %550 = dma.vmem_to_hbm [thread:$0]  (%p942_p4), %s335_s26, 128, %s337_s27, %s311_s29  }
  0xaf   : > { %s843_s9 = smov 64   ;;  %s347_s14 = scalar_lea.hbm %s1065_s3, %s981_s25 }
  0xb0   : > { %s315_s22 = sand.u32 1, %s900_s21   ;;  %s263_s6 = scalar_lea.vmem [#allocation8], %s967_s23 }
  0xb1   : > { %s349_s18 = sshll.u32 %s263_s6, 4  ;;  %s351_s7 = sshll.u32 %s347_s14, 4  ;;  %s350_s18 = int_to_ptr.vmem [resolvable:$true] %s349_s18  ;;  %s352_s7 = int_to_ptr.hbm [resolvable:$true] %s351_s7 }
  0xb2   : > { %s362_s26 = scalar_lea.hbm %s1066_s4, %s981_s25  ;;  %s1011_s27 = scalar_lea.sflag [#allocation9], %s315_s22 }
  0xb3   : > { %s733_s29 = sshra.s32 %s352_s7, 4  ;;  %s739_s28 = scalar_lea.hbm %s1065_s3, 16  ;;  %s734_s29 = int_to_ptr.hbm [resolvable:$true] %s733_s29 }
  0xb4   : > { %306 = vrot.lane.b32.xlu0 %v297_v5, %s843_s9  ;;  %s735_s9 = scalar_lea.hbm %s734_s29, 8  ;;  %p740_p8 = scmp.lt.s32.totalorder %s734_s29, %s1065_s3 }
  0xb5   : > { %p736_p0 = scmp.ne.s32.totalorder %s734_s29, %s735_s9  ;;  %p741_p1 = scmp.lt.s32.totalorder %s739_s28, %s735_s9 }
  0xb7   : > { %p737_p2 = pnand %p736_p0, %p942_p4  ;;  %p742_p3 = por %p741_p1, %p740_p8 }
  0xb9   : > { %p738_p5 = pneg %p737_p2 }
  0xbb   : > { %p743_p9 = pnand %p742_p3, %p738_p5 }
 0x11e   : > { %v303_v6 = vpop.permute.xlu0 %302 }
 0x11f   : > { %305 = vst.msk [vmem:[%s263_s6] sm:$0xff] %vm276_vm0, %v303_v6 }
 0x120   : > { %746 = shalt.err (!%p743_p9)
}
 0x121   : > { %551 = dma.vmem_to_hbm [thread:$0]  (%p942_p4), %s350_s18, 128, %s352_s7, %s1011_s27  }
 0x122   : > { %s270_s25 = scalar_lea.vmem [#allocation10], %s967_s23  ;;  %s366_s6 = sshll.u32 %s362_s26, 4  ;;  %s367_s6 = int_to_ptr.hbm [resolvable:$true] %s366_s6 }
 0x123   : > { %s364_s22 = sshll.u32 %s270_s25, 4  ;;  %s761_s30 = sshra.s32 %s367_s6, 4  ;;  %s365_s22 = int_to_ptr.vmem [resolvable:$true] %s364_s22  ;;  %s762_s30 = int_to_ptr.hbm [resolvable:$true] %s761_s30 }
 0x124   : > { %s763_s8 = scalar_lea.hbm %s762_s30, 8  ;;  %s767_s9 = scalar_lea.hbm %s1066_s4, 16 }
 0x125   : > { %p764_p10 = scmp.ne.s32.totalorder %s762_s30, %s763_s8  ;;  %p768_p13 = scmp.lt.s32.totalorder %s762_s30, %s1066_s4 }
 0x126   : > { %v307_v7 = vpop.permute.xlu0 %306  ;;  %p769_p0 = scmp.lt.s32.totalorder %s767_s9, %s763_s8 }
 0x127   : > { %309 = vst.msk [vmem:[%s270_s25] sm:$0xff] %vm276_vm0, %v307_v7  ;;  %p765_p11 = pnand %p764_p10, %p942_p4 }
 0x128   : > { %p770_p2 = por %p769_p0, %p768_p13 }
 0x129   : > { %p766_p12 = pneg %p765_p11 }
 0x12b   : > { %p771_p5 = pnand %p770_p2, %p766_p12 }
 0x12d   : > { %774 = shalt.err (!%p771_p5)
}
 0x12e   : > { %552 = dma.vmem_to_hbm [thread:$0]  (%p942_p4), %s365_s22, 128, %s367_s6, %s1011_s27  }
 0x12f PF: > { %s378_s7 = sand.u32 1, %s817_s15   ;;  %p565_p8 = pnand %p526_p6, %p950_p7 }
 0x130   : > { %s379_s26 = scalar_lea.sflag [#allocation4], %s378_s7 }
 0x131   : > { %p566_p1 = pneg %p565_p8 }
 0x133   : > { %808 = dma.done.wait (%p566_p1), %s379_s26, 128  }
 0x134   : > { %810 = vsyncadd (%p566_p1), %s379_s26, 4294967168  ;;  %s1073_s21 = sadd.s32 4294967294, %s837_s20  }
 0x135   : > { %s388_s24 = sand.u32 1, %s1073_s21  }
 0x136   : > { %s389_s28 = scalar_lea.sflag [#allocation9], %s388_s24 }
 0x137   : > { %812 = dma.done.wait (%p566_p1), %s389_s28, 256  }
 0x138   : > { %814 = vsyncadd (%p566_p1), %s389_s28, 4294967040  ;;  %s25_s20 = sadd.s32 1, %s837_s20   ;;  %s1074_s15 = smov %s821_s16 }
 0x139   : > { %p22_p4 = scmp.ge.s32.totalorder %s25_s20, 4   ;;  %s1075_s16 = smov %s825_s17 }
 0x13a   : > { %s1076_s17 = smov %s948_s11  ;;  %s1077_s18 = smov %s833_s19 }
 0x13b   : > { %s1078_s19 = smov %s1080_s5  ;;  %24 = sbr.rel (!%p22_p4) target bundleno = 9 (0x9), region = 109 }
 0x140   :  { %405 = vsyncpa [#allocation3], 1 }
 0x141   :  { %407 = vsyncpa [#allocation3 + $0x1], 1 }
 0x142   :  { %408 = vsyncpa [#allocation6], 1 }
 0x143   :  { %409 = vsyncpa [#allocation4], 1 }
 0x144   :  { %411 = vsyncpa [#allocation4 + $0x1], 1 }
 0x145   :  { %412 = vsyncpa [#allocation9], 1 }
 0x146   :  { %414 = vsyncpa [#allocation9 + $0x1], 1 }

</bundles_post_ra>
